<compile_context>
chip_gen: v6e
topology: v6e:2x2x1
jax: 0.10.0
libtpu: 0.0.40
codegen_flags: <defaults>
</compile_context>

<pallas_src>
import functools

import jax
import jax.numpy as jnp
from jax import lax
from jax.experimental import pallas as pl
from jax.experimental.pallas import tpu as pltpu


# --------------------------- fused kernel -----------------------------------
def _fused_resnet1d_kernel(x_ref, w1_ref, b1_ref, w2_ref, b2_ref,
                           w2l_ref, b2l_ref, o_ref, hpad_ref,
                           *, L, C, PAD, dilations, batch_tile):
    """All 3 ResNet1D blocks for `batch_tile` batch elements, fully fused.

    x_ref   : (Bt, C, L)         NCL block input (PyTorch Conv1d layout)
    w1_ref  : (n_blocks, 3C, C)  dilated-conv weights, taps stacked on rows (bf16)
    b1_ref  : (n_blocks, 1, C)   f32
    w2_ref  : (n_blocks, C, C)   1x1 conv weights, (C_in, C_out) (bf16)
    b2_ref  : (n_blocks, 1, C)   f32
    w2l_ref : (C, C)             LAST block 1x1 weights, (C_out, C_in) (bf16)
    b2l_ref : (C, 1)             LAST block 1x1 bias, channels-first (f32)
    o_ref   : (Bt, C, L)         NCL output block
    hpad_ref: (Bt*(L+2*PAD), C)  f32 VMEM scratch, zero-haloed padded activation
    """
    n_blocks = len(dilations)
    Bt = batch_tile
    Lp = L + 2 * PAD
    M = Bt * L

    # Zero the halo rows of the padded scratch for every resident batch
    # element.  Must be unconditional (NOT guarded on program_id == 0): with a
    # "parallel" batch grid axis each TensorCore owns its own scratch and may
    # start at any grid index.
    halo = jnp.zeros((PAD, C), jnp.float32)
    for bt in range(Bt):
        base = bt * Lp
        hpad_ref[base:base + PAD, :] = halo
        hpad_ref[base + PAD + L:base + Lp, :] = halo

    # ---- fused NCL -> NLC input relayout (minor-dims XLU transpose) --------
    # Removes the wrapper-side transpose launch + its HBM round trip.
    x_lc = [jnp.transpose(x_ref[bt], (1, 0)).astype(jnp.float32)
            for bt in range(Bt)]                                   # Bt x (L, C)
    cur = x_lc[0] if Bt == 1 else jnp.concatenate(x_lc, axis=0)    # (M, C) f32

    for i, d in enumerate(dilations):                 # static Python loop
        # ReLU in f32 (VPU); bf16 only for MXU operands.
        h = jnp.maximum(cur, 0.0)                     # (M, C) f32
        h_bf = h.astype(jnp.bfloat16)

        # Scatter the ReLU'd rows into the zero-haloed scratch (aligned
        # stores; ReLU(0) == 0, so relu-then-pad == pad-then-relu), then
        # gather the +/-d shifted taps.  Centre tap comes from registers.
        for bt in range(Bt):
            base = bt * Lp + PAD
            hpad_ref[base:base + L, :] = h[bt * L:(bt + 1) * L, :]

        h3_parts = []
        for bt in range(Bt):
            base = bt * Lp + PAD
            left = hpad_ref[base - d:base - d + L, :].astype(jnp.bfloat16)
            mid = h_bf[bt * L:(bt + 1) * L, :]
            right = hpad_ref[base + d:base + d + L, :].astype(jnp.bfloat16)
            h3_parts.append(jnp.concatenate([left, mid, right], axis=-1))
        h3 = h3_parts[0] if Bt == 1 else jnp.concatenate(h3_parts, axis=0)

        # Dilated 3-tap conv as ONE MXU matmul (M, 3C) x (3C, C).
        y1 = jnp.dot(h3, w1_ref[i], preferred_element_type=jnp.float32)
        y1 = y1 + b1_ref[i]                            # f32 bias (VPU path)
        h2 = jnp.maximum(y1, 0.0).astype(jnp.bfloat16)  # ReLU -> 1x1 conv

        if i < n_blocks - 1:
            # 1x1 conv; residual feeds the NEXT block's input.
            y2 = jnp.dot(h2, w2_ref[i], preferred_element_type=jnp.float32)
            cur = y2 + b2_ref[i] + cur
        else:
            # Final block: NO residual add (matches the PyTorch module).  The
            # 1x1 conv is computed directly channels-first,
            #   (C_out, L) = W2 (C_out, C_in) . h2 (L, C_in)  contracted on C_in
            # (MXU "NT" matmul), which folds the NLC -> NCL output relayout
            # into the matmul at zero extra cost.
            for bt in range(Bt):
                h2_bt = h2[bt * L:(bt + 1) * L, :]                 # (L, C) bf16
                y2_cf = lax.dot_general(
                    w2l_ref[...], h2_bt,
                    dimension_numbers=(((1,), (1,)), ((), ())),
                    preferred_element_type=jnp.float32)            # (C, L)
                o_ref[bt] = (y2_cf + b2l_ref[...]).astype(o_ref.dtype)


# --------------------------- wrappers ----------------------------------------
def prepare_params(params):
    """One-time parameter re-layout (hoisted out of the per-call path).

    params: list of (w1, b1, w2, b2, dilation) in PyTorch Conv1d layout:
        w1 (C, C, 3), b1 (C,), w2 (C, C, 1), b2 (C,)
    Returns MXU-friendly tensors:
        w1_all (n, 3C, C) bf16, b1_all (n, 1, C) f32,
        w2_all (n, C, C)  bf16 (C_in, C_out), b2_all (n, 1, C) f32,
        w2_last_cf (C, C) bf16 (C_out, C_in), b2_last_cf (C, 1) f32,
        dilations (tuple of int)
    """
    w1s, b1s, w2s, b2s, dils = [], [], [], [], []
    for (w1, b1, w2, b2, d) in params:
        C = w1.shape[0]
        # (C_out, C_in, 3) -> (3, C_in, C_out) -> (3*C_in, C_out)
        w1s.append(jnp.transpose(w1, (2, 1, 0)).reshape(3 * C, C)
                   .astype(jnp.bfloat16))
        b1s.append(b1.reshape(1, C).astype(jnp.float32))
        w2s.append(jnp.transpose(w2[:, :, 0], (1, 0)).astype(jnp.bfloat16))
        b2s.append(b2.reshape(1, C).astype(jnp.float32))
        dils.append(int(d))
    C = params[-1][0].shape[0]
    # Last block's 1x1 conv, kept channels-first for the fused output relayout.
    w2_last_cf = params[-1][2][:, :, 0].astype(jnp.bfloat16)        # (C_out, C_in)
    b2_last_cf = params[-1][3].reshape(C, 1).astype(jnp.float32)
    return (jnp.stack(w1s), jnp.stack(b1s), jnp.stack(w2s), jnp.stack(b2s),
            w2_last_cf, b2_last_cf, tuple(dils))


def _choose_batch_tile(B, L, target_rows=256):
    """Largest divisor of B with batch_tile*L <= target MXU rows while keeping
    >= 2 grid steps when B >= 2 (so v7x's two TensorCores both get work)."""
    best = 1
    for cand in range(1, B + 1):
        if B % cand != 0:
            continue
        if cand * L > target_rows:
            continue
        if B >= 2 and B // cand < 2:
            continue
        best = cand
    return best


@functools.partial(jax.jit, static_argnames=("dilations", "batch_tile"))
def resnet1d_forward(x_ncl, w1_all, b1_all, w2_all, b2_all, w2l_cf, b2l_cf,
                     *, dilations, batch_tile=None):
    """Full Resnet1D forward.  PyTorch Conv1d layout (B, C, L) in and out,
    with the NCL<->NLC relayout fused inside the kernel (no wrapper transposes).
    """
    B, C, L = x_ncl.shape
    n_blocks = len(dilations)
    if batch_tile is None:
        batch_tile = _choose_batch_tile(B, L)
    Bt = batch_tile
    assert B % Bt == 0, "batch_tile must divide the batch size"

    PAD = max(8, ((max(dilations) + 7) // 8) * 8)   # 8-aligned halo >= max dil
    Lp = L + 2 * PAD

    kernel = functools.partial(_fused_resnet1d_kernel, L=L, C=C, PAD=PAD,
                               dilations=tuple(dilations), batch_tile=Bt)

    itemsize = x_ncl.dtype.itemsize
    flops = 2 * B * L * n_blocks * (3 * C * C + C * C)
    bytes_accessed = (2 * B * C * L * itemsize
                      + 2 * (w1_all.size + w2_all.size + w2l_cf.size)
                      + 4 * (b1_all.size + b2_all.size + b2l_cf.size))

    return pl.pallas_call(
        kernel,
        out_shape=jax.ShapeDtypeStruct((B, C, L), x_ncl.dtype),
        grid=(B // Bt,),
        in_specs=[
            pl.BlockSpec((Bt, C, L), lambda b: (b, 0, 0)),             # activations
            pl.BlockSpec((n_blocks, 3 * C, C), lambda b: (0, 0, 0)),   # W1 (stacked)
            pl.BlockSpec((n_blocks, 1, C), lambda b: (0, 0, 0)),       # b1
            pl.BlockSpec((n_blocks, C, C), lambda b: (0, 0, 0)),       # W2 (1x1)
            pl.BlockSpec((n_blocks, 1, C), lambda b: (0, 0, 0)),       # b2
            pl.BlockSpec((C, C), lambda b: (0, 0)),                    # W2 last (cf)
            pl.BlockSpec((C, 1), lambda b: (0, 0)),                    # b2 last (cf)
        ],
        out_specs=pl.BlockSpec((Bt, C, L), lambda b: (b, 0, 0)),
        scratch_shapes=[pltpu.VMEM((Bt * Lp, C), jnp.float32)],
        compiler_params=pltpu.CompilerParams(
            dimension_semantics=("parallel",),      # batch across TCs on v7x
            # Explicit scoped-VMEM budget (re-derive if L is tiled up; v7x has
            # 64 MiB/TC physical, v5e's scoped default is only 16 MiB).
            vmem_limit_bytes=32 * 1024 * 1024),
        cost_estimate=pl.CostEstimate(flops=flops, transcendentals=0,
                                      bytes_accessed=bytes_accessed),
    )(x_ncl, w1_all, b1_all, w2_all, b2_all, w2l_cf, b2l_cf)


# --------------------------- references --------------------------------------
def _ref_block_f32(x, w1, b1, w2, b2, d):
    h = jax.nn.relu(x)
    y = lax.conv_general_dilated(
        h, w1, window_strides=(1,), padding=[(d, d)], rhs_dilation=(d,),
        dimension_numbers=("NCH", "OIH", "NCH")) + b1[None, :, None]
    h2 = jax.nn.relu(y)
    y2 = lax.conv_general_dilated(
        h2, w2, window_strides=(1,), padding=[(0, 0)],
        dimension_numbers=("NCH", "OIH", "NCH")) + b2[None, :, None]
    return y2


def _ref_forward_f32(x, params):
    b1_out = _ref_block_f32(x, *params[0][:4], params[0][4])
    b2_in = b1_out + x
    b2_out = _ref_block_f32(b2_in, *params[1][:4], params[1][4])
    b3_in = b2_out + b2_in
    return _ref_block_f32(b3_in, *params[2][:4], params[2][4])


def _mirror_forward_bf16(x_blc, w1_all, b1_all, w2_all, b2_all, dilations, PAD):
    """Pure-JAX mirror of the exact in-kernel math (bf16 operands, f32 acc)."""
    n_blocks = len(dilations)
    L = x_blc.shape[1]

    def one(x_lc):
        cur = x_lc.astype(jnp.float32)
        for i, d in enumerate(dilations):
            hp = jnp.pad(jnp.maximum(cur, 0.0), ((PAD, PAD), (0, 0)))
            taps = [hp[PAD - d + k * d: PAD - d + k * d + L, :].astype(jnp.bfloat16)
                    for k in range(3)]
            h3 = jnp.concatenate(taps, axis=-1)
            y1 = jnp.dot(h3, w1_all[i], preferred_element_type=jnp.float32) + b1_all[i]
            h2 = jnp.maximum(y1, 0.0).astype(jnp.bfloat16)
            y2 = jnp.dot(h2, w2_all[i], preferred_element_type=jnp.float32) + b2_all[i]
            cur = (y2 + cur) if i < n_blocks - 1 else y2
        return cur

    return jax.vmap(one)(x_blc)


# --------------------------- demo / check ------------------------------------
if __name__ == "__main__":
    key = jax.random.PRNGKey(0)
    B, C, L = 2, 128, 16            # small shapes; emb_dim -> C, seq length -> L
    keys = jax.random.split(key, 13)

    x = jax.random.normal(keys[0], (B, C, L), jnp.float32)   # (B, C, L) NCL

    def conv_init(kw, kb, cout, cin, ksize):
        # PyTorch-style uniform(-1/sqrt(fan_in), 1/sqrt(fan_in))
        fan_in = cin * ksize
        bound = 1.0 / (fan_in ** 0.5)
        w = jax.random.uniform(kw, (cout, cin, ksize), jnp.float32, -bound, bound)
        b = jax.random.uniform(kb, (cout,), jnp.float32, -bound, bound)
        return w, b

    params = []
    ki = 1
    for dil in (9, 3, 1):           # block1: pad=dil=9, block2: 3, block3: 1
        w1, b1 = conv_init(keys[ki], keys[ki + 1], C, C, 3); ki += 2
        w2, b2 = conv_init(keys[ki], keys[ki + 1], C, C, 1); ki += 2
        params.append((w1, b1, w2, b2, dil))

    (w1_all, b1_all, w2_all, b2_all,
     w2l_cf, b2l_cf, dilations) = prepare_params(params)

    out = resnet1d_forward(x, w1_all, b1_all, w2_all, b2_all, w2l_cf, b2l_cf,
                           dilations=dilations)
    out = jax.block_until_ready(out)
    assert out.shape == x.shape and out.dtype == x.dtype

    # Tight check: pure-JAX mirror of the in-kernel math (same bf16 casts,
    # f32 accumulation) — only accumulation-order differences remain.
    PAD = max(8, ((max(dilations) + 7) // 8) * 8)
    mirror = _mirror_forward_bf16(jnp.transpose(x, (0, 2, 1)), w1_all, b1_all,
                                  w2_all, b2_all, dilations, PAD)
    mirror = jnp.transpose(mirror, (0, 2, 1))
    err_m = jnp.max(jnp.abs(out - mirror))
    assert jnp.allclose(out, mirror, rtol=1e-3, atol=1e-3), \
        f"mirror max abs err {err_m}"

    # Loose check vs all-f32 conv reference (tolerance covers the documented
    # bf16-matmul-operand precision contract).
    ref = jax.block_until_ready(_ref_forward_f32(x, params))
    err_r = jnp.max(jnp.abs(out - ref))
    assert jnp.allclose(out, ref, rtol=2e-2, atol=2e-2), \
        f"f32 reference max abs err {err_r}"

    print("KERNEL_OK")
</pallas_src>

<mosaic_0001>
module attributes {stable_mosaic.version = 11 : i64} {
  func.func @_fused_resnet1d_kernel(%arg0: i32, %arg1: memref<1x128x16xf32, #tpu.memory_space<vmem>>, %arg2: memref<3x384x128xbf16, #tpu.memory_space<vmem>>, %arg3: memref<3x1x128xf32, #tpu.memory_space<vmem>>, %arg4: memref<3x128x128xbf16, #tpu.memory_space<vmem>>, %arg5: memref<3x1x128xf32, #tpu.memory_space<vmem>>, %arg6: memref<128x128xbf16, #tpu.memory_space<vmem>>, %arg7: memref<128x1xf32, #tpu.memory_space<vmem>>, %arg8: memref<1x128x16xf32, #tpu.memory_space<vmem>>, %arg9: memref<48x128xf32, #tpu.memory_space<vmem>>) attributes {dimension_semantics = [#tpu.dimension_semantics<parallel>], iteration_bounds = array<i64: 2>, scalar_prefetch = 0 : i64, scratch_operands = 1 : i64, tpu.core_type = #tpu.core_type<tc>, window_params = [{transform_indices = @transform_0, window_bounds = array<i64: 1, 128, 16>}, {pipeline_mode = #tpu.pipeline_mode<synchronous>, transform_indices = @transform_1, window_bounds = array<i64: 3, 384, 128>}, {pipeline_mode = #tpu.pipeline_mode<synchronous>, transform_indices = @transform_2, window_bounds = array<i64: 3, 1, 128>}, {pipeline_mode = #tpu.pipeline_mode<synchronous>, transform_indices = @transform_3, window_bounds = array<i64: 3, 128, 128>}, {pipeline_mode = #tpu.pipeline_mode<synchronous>, transform_indices = @transform_4, window_bounds = array<i64: 3, 1, 128>}, {pipeline_mode = #tpu.pipeline_mode<synchronous>, transform_indices = @transform_5, window_bounds = array<i64: 128, 128>}, {pipeline_mode = #tpu.pipeline_mode<synchronous>, transform_indices = @transform_6, window_bounds = array<i64: 128, 1>}, {transform_indices = @transform_7, window_bounds = array<i64: 1, 128, 16>}]} {
    %cst = arith.constant 0.000000e+00 : f32
    %0 = vector.broadcast %cst : f32 to vector<16x128xf32>
    %c0 = arith.constant 0 : index
    %c0_0 = arith.constant 0 : index
    %1 = vector.load %arg9[%c0, %c0_0] : memref<48x128xf32, #tpu.memory_space<vmem>>, vector<16x128xf32>
    tpu.vector_store %arg9[%c0, %c0_0], %0 {strides = array<i32>} : memref<48x128xf32, #tpu.memory_space<vmem>>, vector<16x128xf32>,
    %c32 = arith.constant 32 : index
    %c0_1 = arith.constant 0 : index
    %2 = vector.load %arg9[%c32, %c0_1] : memref<48x128xf32, #tpu.memory_space<vmem>>, vector<16x128xf32>
    tpu.vector_store %arg9[%c32, %c0_1], %0 {strides = array<i32>} : memref<48x128xf32, #tpu.memory_space<vmem>>, vector<16x128xf32>,
    %c0_2 = arith.constant 0 : index
    %c0_3 = arith.constant 0 : index
    %c0_4 = arith.constant 0 : index
    %3 = vector.load %arg1[%c0_2, %c0_3, %c0_4] : memref<1x128x16xf32, #tpu.memory_space<vmem>>, vector<1x128x16xf32>
    %4 = vector.shape_cast %3 : vector<1x128x16xf32> to vector<128x16xf32>
    %5 = tpu.transpose %4, [1, 0] : vector<128x16xf32> -> vector<16x128xf32>
    %cst_5 = arith.constant 0.000000e+00 : f32
    %6 = vector.broadcast %cst_5 : f32 to vector<16x128xf32>
    %7 = arith.maximumf %5, %6 : vector<16x128xf32>
    %8 = arith.truncf %7 : vector<16x128xf32> to vector<16x128xbf16>
    %c16 = arith.constant 16 : index
    %c0_6 = arith.constant 0 : index
    %9 = vector.load %arg9[%c16, %c0_6] : memref<48x128xf32, #tpu.memory_space<vmem>>, vector<16x128xf32>
    tpu.vector_store %arg9[%c16, %c0_6], %7 {strides = array<i32>} : memref<48x128xf32, #tpu.memory_space<vmem>>, vector<16x128xf32>,
    %c7 = arith.constant 7 : index
    %c0_7 = arith.constant 0 : index
    %10 = vector.load %arg9[%c7, %c0_7] : memref<48x128xf32, #tpu.memory_space<vmem>>, vector<16x128xf32>
    %11 = arith.truncf %10 : vector<16x128xf32> to vector<16x128xbf16>
    %c25 = arith.constant 25 : index
    %c0_8 = arith.constant 0 : index
    %12 = vector.load %arg9[%c25, %c0_8] : memref<48x128xf32, #tpu.memory_space<vmem>>, vector<16x128xf32>
    %13 = arith.truncf %12 : vector<16x128xf32> to vector<16x128xbf16>
    %14 = tpu.concatenate %11, %8, %13 in 1 : vector<16x128xbf16>, vector<16x128xbf16>, vector<16x128xbf16> -> vector<16x384xbf16>
    %c0_9 = arith.constant 0 : index
    %c0_10 = arith.constant 0 : index
    %c0_11 = arith.constant 0 : index
    %15 = vector.load %arg2[%c0_9, %c0_10, %c0_11] : memref<3x384x128xbf16, #tpu.memory_space<vmem>>, vector<1x384x128xbf16>
    %16 = vector.shape_cast %15 : vector<1x384x128xbf16> to vector<384x128xbf16>
    %cst_12 = arith.constant dense<0.000000e+00> : vector<16x128xf32>
    %17 = tpu.matmul %14, %16, %cst_12 {dimension_numbers = #tpu.dot_dimension_numbers<[1], [0], [0], [1], [0, 0, 1, 1], [], []>} : vector<16x384xbf16>, vector<384x128xbf16>, vector<16x128xf32> -> vector<16x128xf32>
    %c0_13 = arith.constant 0 : index
    %c0_14 = arith.constant 0 : index
    %c0_15 = arith.constant 0 : index
    %18 = vector.load %arg3[%c0_13, %c0_14, %c0_15] : memref<3x1x128xf32, #tpu.memory_space<vmem>>, vector<1x1x128xf32>
    %19 = vector.shape_cast %18 : vector<1x1x128xf32> to vector<1x128xf32>
    %20 = vector.broadcast %19 : vector<1x128xf32> to vector<16x128xf32>
    %21 = arith.addf %17, %20 : vector<16x128xf32>
    %cst_16 = arith.constant 0.000000e+00 : f32
    %22 = vector.broadcast %cst_16 : f32 to vector<16x128xf32>
    %23 = arith.maximumf %21, %22 : vector<16x128xf32>
    %24 = arith.truncf %23 : vector<16x128xf32> to vector<16x128xbf16>
    %c0_17 = arith.constant 0 : index
    %c0_18 = arith.constant 0 : index
    %c0_19 = arith.constant 0 : index
    %25 = vector.load %arg4[%c0_17, %c0_18, %c0_19] : memref<3x128x128xbf16, #tpu.memory_space<vmem>>, vector<1x128x128xbf16>
    %26 = vector.shape_cast %25 : vector<1x128x128xbf16> to vector<128x128xbf16>
    %cst_20 = arith.constant dense<0.000000e+00> : vector<16x128xf32>
    %27 = tpu.matmul %24, %26, %cst_20 {dimension_numbers = #tpu.dot_dimension_numbers<[1], [0], [0], [1], [0, 0, 1, 1], [], []>} : vector<16x128xbf16>, vector<128x128xbf16>, vector<16x128xf32> -> vector<16x128xf32>
    %c0_21 = arith.constant 0 : index
    %c0_22 = arith.constant 0 : index
    %c0_23 = arith.constant 0 : index
    %28 = vector.load %arg5[%c0_21, %c0_22, %c0_23] : memref<3x1x128xf32, #tpu.memory_space<vmem>>, vector<1x1x128xf32>
    %29 = vector.shape_cast %28 : vector<1x1x128xf32> to vector<1x128xf32>
    %30 = vector.broadcast %29 : vector<1x128xf32> to vector<16x128xf32>
    %31 = arith.addf %27, %30 : vector<16x128xf32>
    %32 = arith.addf %31, %5 : vector<16x128xf32>
    %cst_24 = arith.constant 0.000000e+00 : f32
    %33 = vector.broadcast %cst_24 : f32 to vector<16x128xf32>
    %34 = arith.maximumf %32, %33 : vector<16x128xf32>
    %35 = arith.truncf %34 : vector<16x128xf32> to vector<16x128xbf16>
    %c16_25 = arith.constant 16 : index
    %c0_26 = arith.constant 0 : index
    %36 = vector.load %arg9[%c16_25, %c0_26] : memref<48x128xf32, #tpu.memory_space<vmem>>, vector<16x128xf32>
    tpu.vector_store %arg9[%c16_25, %c0_26], %34 {strides = array<i32>} : memref<48x128xf32, #tpu.memory_space<vmem>>, vector<16x128xf32>,
    %c13 = arith.constant 13 : index
    %c0_27 = arith.constant 0 : index
    %37 = vector.load %arg9[%c13, %c0_27] : memref<48x128xf32, #tpu.memory_space<vmem>>, vector<16x128xf32>
    %38 = arith.truncf %37 : vector<16x128xf32> to vector<16x128xbf16>
    %c19 = arith.constant 19 : index
    %c0_28 = arith.constant 0 : index
    %39 = vector.load %arg9[%c19, %c0_28] : memref<48x128xf32, #tpu.memory_space<vmem>>, vector<16x128xf32>
    %40 = arith.truncf %39 : vector<16x128xf32> to vector<16x128xbf16>
    %41 = tpu.concatenate %38, %35, %40 in 1 : vector<16x128xbf16>, vector<16x128xbf16>, vector<16x128xbf16> -> vector<16x384xbf16>
    %c1 = arith.constant 1 : index
    %c0_29 = arith.constant 0 : index
    %c0_30 = arith.constant 0 : index
    %42 = vector.load %arg2[%c1, %c0_29, %c0_30] : memref<3x384x128xbf16, #tpu.memory_space<vmem>>, vector<1x384x128xbf16>
    %43 = vector.shape_cast %42 : vector<1x384x128xbf16> to vector<384x128xbf16>
    %cst_31 = arith.constant dense<0.000000e+00> : vector<16x128xf32>
    %44 = tpu.matmul %41, %43, %cst_31 {dimension_numbers = #tpu.dot_dimension_numbers<[1], [0], [0], [1], [0, 0, 1, 1], [], []>} : vector<16x384xbf16>, vector<384x128xbf16>, vector<16x128xf32> -> vector<16x128xf32>
    %c1_32 = arith.constant 1 : index
    %c0_33 = arith.constant 0 : index
    %c0_34 = arith.constant 0 : index
    %45 = vector.load %arg3[%c1_32, %c0_33, %c0_34] : memref<3x1x128xf32, #tpu.memory_space<vmem>>, vector<1x1x128xf32>
    %46 = vector.shape_cast %45 : vector<1x1x128xf32> to vector<1x128xf32>
    %47 = vector.broadcast %46 : vector<1x128xf32> to vector<16x128xf32>
    %48 = arith.addf %44, %47 : vector<16x128xf32>
    %cst_35 = arith.constant 0.000000e+00 : f32
    %49 = vector.broadcast %cst_35 : f32 to vector<16x128xf32>
    %50 = arith.maximumf %48, %49 : vector<16x128xf32>
    %51 = arith.truncf %50 : vector<16x128xf32> to vector<16x128xbf16>
    %c1_36 = arith.constant 1 : index
    %c0_37 = arith.constant 0 : index
    %c0_38 = arith.constant 0 : index
    %52 = vector.load %arg4[%c1_36, %c0_37, %c0_38] : memref<3x128x128xbf16, #tpu.memory_space<vmem>>, vector<1x128x128xbf16>
    %53 = vector.shape_cast %52 : vector<1x128x128xbf16> to vector<128x128xbf16>
    %cst_39 = arith.constant dense<0.000000e+00> : vector<16x128xf32>
    %54 = tpu.matmul %51, %53, %cst_39 {dimension_numbers = #tpu.dot_dimension_numbers<[1], [0], [0], [1], [0, 0, 1, 1], [], []>} : vector<16x128xbf16>, vector<128x128xbf16>, vector<16x128xf32> -> vector<16x128xf32>
    %c1_40 = arith.constant 1 : index
    %c0_41 = arith.constant 0 : index
    %c0_42 = arith.constant 0 : index
    %55 = vector.load %arg5[%c1_40, %c0_41, %c0_42] : memref<3x1x128xf32, #tpu.memory_space<vmem>>, vector<1x1x128xf32>
    %56 = vector.shape_cast %55 : vector<1x1x128xf32> to vector<1x128xf32>
    %57 = vector.broadcast %56 : vector<1x128xf32> to vector<16x128xf32>
    %58 = arith.addf %54, %57 : vector<16x128xf32>
    %59 = arith.addf %58, %32 : vector<16x128xf32>
    %cst_43 = arith.constant 0.000000e+00 : f32
    %60 = vector.broadcast %cst_43 : f32 to vector<16x128xf32>
    %61 = arith.maximumf %59, %60 : vector<16x128xf32>
    %62 = arith.truncf %61 : vector<16x128xf32> to vector<16x128xbf16>
    %c16_44 = arith.constant 16 : index
    %c0_45 = arith.constant 0 : index
    %63 = vector.load %arg9[%c16_44, %c0_45] : memref<48x128xf32, #tpu.memory_space<vmem>>, vector<16x128xf32>
    tpu.vector_store %arg9[%c16_44, %c0_45], %61 {strides = array<i32>} : memref<48x128xf32, #tpu.memory_space<vmem>>, vector<16x128xf32>,
    %c15 = arith.constant 15 : index
    %c0_46 = arith.constant 0 : index
    %64 = vector.load %arg9[%c15, %c0_46] : memref<48x128xf32, #tpu.memory_space<vmem>>, vector<16x128xf32>
    %65 = arith.truncf %64 : vector<16x128xf32> to vector<16x128xbf16>
    %c17 = arith.constant 17 : index
    %c0_47 = arith.constant 0 : index
    %66 = vector.load %arg9[%c17, %c0_47] : memref<48x128xf32, #tpu.memory_space<vmem>>, vector<16x128xf32>
    %67 = arith.truncf %66 : vector<16x128xf32> to vector<16x128xbf16>
    %68 = tpu.concatenate %65, %62, %67 in 1 : vector<16x128xbf16>, vector<16x128xbf16>, vector<16x128xbf16> -> vector<16x384xbf16>
    %c2 = arith.constant 2 : index
    %c0_48 = arith.constant 0 : index
    %c0_49 = arith.constant 0 : index
    %69 = vector.load %arg2[%c2, %c0_48, %c0_49] : memref<3x384x128xbf16, #tpu.memory_space<vmem>>, vector<1x384x128xbf16>
    %70 = vector.shape_cast %69 : vector<1x384x128xbf16> to vector<384x128xbf16>
    %cst_50 = arith.constant dense<0.000000e+00> : vector<16x128xf32>
    %71 = tpu.matmul %68, %70, %cst_50 {dimension_numbers = #tpu.dot_dimension_numbers<[1], [0], [0], [1], [0, 0, 1, 1], [], []>} : vector<16x384xbf16>, vector<384x128xbf16>, vector<16x128xf32> -> vector<16x128xf32>
    %c2_51 = arith.constant 2 : index
    %c0_52 = arith.constant 0 : index
    %c0_53 = arith.constant 0 : index
    %72 = vector.load %arg3[%c2_51, %c0_52, %c0_53] : memref<3x1x128xf32, #tpu.memory_space<vmem>>, vector<1x1x128xf32>
    %73 = vector.shape_cast %72 : vector<1x1x128xf32> to vector<1x128xf32>
    %74 = vector.broadcast %73 : vector<1x128xf32> to vector<16x128xf32>
    %75 = arith.addf %71, %74 : vector<16x128xf32>
    %cst_54 = arith.constant 0.000000e+00 : f32
    %76 = vector.broadcast %cst_54 : f32 to vector<16x128xf32>
    %77 = arith.maximumf %75, %76 : vector<16x128xf32>
    %78 = arith.truncf %77 : vector<16x128xf32> to vector<16x128xbf16>
    %c0_55 = arith.constant 0 : index
    %c0_56 = arith.constant 0 : index
    %79 = vector.load %arg6[%c0_55, %c0_56] : memref<128x128xbf16, #tpu.memory_space<vmem>>, vector<128x128xbf16>
    %cst_57 = arith.constant dense<0.000000e+00> : vector<128x16xf32>
    %80 = tpu.matmul %79, %78, %cst_57 {dimension_numbers = #tpu.dot_dimension_numbers<[1], [1], [0], [0], [0, 0, 1, 0], [], []>} : vector<128x128xbf16>, vector<16x128xbf16>, vector<128x16xf32> -> vector<128x16xf32>
    %c0_58 = arith.constant 0 : index
    %c0_59 = arith.constant 0 : index
    %81 = vector.load %arg7[%c0_58, %c0_59] : memref<128x1xf32, #tpu.memory_space<vmem>>, vector<128x1xf32>
    %82 = vector.broadcast %81 : vector<128x1xf32> to vector<128x16xf32>
    %83 = arith.addf %80, %82 : vector<128x16xf32>
    %c0_60 = arith.constant 0 : index
    %c0_61 = arith.constant 0 : index
    %c0_62 = arith.constant 0 : index
    %84 = vector.load %arg8[%c0_60, %c0_61, %c0_62] : memref<1x128x16xf32, #tpu.memory_space<vmem>>, vector<1x128x16xf32>
    %85 = vector.shape_cast %84 : vector<1x128x16xf32> to vector<128x16xf32>
    %86 = vector.shape_cast %83 : vector<128x16xf32> to vector<1x128x16xf32>
    tpu.vector_store %arg8[%c0_60, %c0_61, %c0_62], %86 {strides = array<i32>} : memref<1x128x16xf32, #tpu.memory_space<vmem>>, vector<1x128x16xf32>,
    return
  }
  func.func @transform_0(%arg0: i32) -> (i32, i32, i32) {
    %c0_i32 = arith.constant 0 : i32
    %c0_i32_0 = arith.constant 0 : i32
    %c0_i32_1 = arith.constant 0 : i32
    return %arg0, %c0_i32, %c0_i32_0 : i32, i32, i32
  }
  func.func @transform_1(%arg0: i32) -> (i32, i32, i32) {
    %c0_i32 = arith.constant 0 : i32
    %c0_i32_0 = arith.constant 0 : i32
    %c0_i32_1 = arith.constant 0 : i32
    %c0_i32_2 = arith.constant 0 : i32
    return %c0_i32, %c0_i32_0, %c0_i32_1 : i32, i32, i32
  }
  func.func @transform_2(%arg0: i32) -> (i32, i32, i32) {
    %c0_i32 = arith.constant 0 : i32
    %c0_i32_0 = arith.constant 0 : i32
    %c0_i32_1 = arith.constant 0 : i32
    %c0_i32_2 = arith.constant 0 : i32
    return %c0_i32, %c0_i32_0, %c0_i32_1 : i32, i32, i32
  }
  func.func @transform_3(%arg0: i32) -> (i32, i32, i32) {
    %c0_i32 = arith.constant 0 : i32
    %c0_i32_0 = arith.constant 0 : i32
    %c0_i32_1 = arith.constant 0 : i32
    %c0_i32_2 = arith.constant 0 : i32
    return %c0_i32, %c0_i32_0, %c0_i32_1 : i32, i32, i32
  }
  func.func @transform_4(%arg0: i32) -> (i32, i32, i32) {
    %c0_i32 = arith.constant 0 : i32
    %c0_i32_0 = arith.constant 0 : i32
    %c0_i32_1 = arith.constant 0 : i32
    %c0_i32_2 = arith.constant 0 : i32
    return %c0_i32, %c0_i32_0, %c0_i32_1 : i32, i32, i32
  }
  func.func @transform_5(%arg0: i32) -> (i32, i32) {
    %c0_i32 = arith.constant 0 : i32
    %c0_i32_0 = arith.constant 0 : i32
    %c0_i32_1 = arith.constant 0 : i32
    return %c0_i32, %c0_i32_0 : i32, i32
  }
  func.func @transform_6(%arg0: i32) -> (i32, i32) {
    %c0_i32 = arith.constant 0 : i32
    %c0_i32_0 = arith.constant 0 : i32
    %c0_i32_1 = arith.constant 0 : i32
    return %c0_i32, %c0_i32_0 : i32, i32
  }
  func.func @transform_7(%arg0: i32) -> (i32, i32, i32) {
    %c0_i32 = arith.constant 0 : i32
    %c0_i32_0 = arith.constant 0 : i32
    %c0_i32_1 = arith.constant 0 : i32
    return %arg0, %c0_i32, %c0_i32_0 : i32, i32, i32
  }
}

</mosaic_0001>

<bundles_post_ra>
// kernel: resnet1d_forward.1
= control target key start
LH: loop header
LB: loop body
LE: loop exit
PB: predicated region body
PF: predicated region fallthrough
CT: control target
= control target key end

     0   :  { %12 = vsyncpa [#allocation4], 0  ;;  %s2389_s24 = smov 0   ;;  %s2690_s0 = inlined_call_operand.vmem [shape: f32[2,128,16], index: 0, kind: input, shape index: {}]   ;;  %s2691_s1 = inlined_call_operand.hbm [shape: bf16[3,384,128], index: 1, kind: input, shape index: {}]   ;;  %s2692_s2 = inlined_call_operand.vmem [shape: f32[3,1,128], index: 2, kind: input, shape index: {}]   ;;  %s2693_s3 = inlined_call_operand.vmem [shape: bf16[3,128,128], index: 3, kind: input, shape index: {}]   ;;  %s2694_s4 = inlined_call_operand.vmem [shape: f32[3,1,128], index: 4, kind: input, shape index: {}]   ;;  %s2695_s5 = inlined_call_operand.vmem [shape: bf16[128,128], index: 5, kind: input, shape index: {}]   ;;  %s2696_s6 = inlined_call_operand.vmem [shape: f32[128,1], index: 6, kind: input, shape index: {}]   ;;  %s2697_s7 = inlined_call_operand.vmem [shape: f32[2,128,16], index: 7, kind: output, shape index: {}]  }
   0x1 LB: > { %s2395_s25 = sadd.s32 4294967295, %s2341_s24   ;;  %p1809_p0 = scmp.ge.s32.totalorder %s2341_s24, 1  ;;  %s2341_s24 = sphi %s2389_s24, %s18_s24  }
   0x2   : > { %p201_p1 = scmp.lt.s32.totalorder %s2341_s24, 3  ;;  %s2343_s26 = smov [#allocation3]  }
   0x3   : > { %s213_s27 = sshll.u32 %s2343_s26, 4  ;;  %p2190_p3 = scmp.eq.s32.totalorder %s2395_s25, 0  ;;  %s214_s27 = int_to_ptr.vmem [resolvable:$true] %s213_s27 }
   0x4   : > { %p2399_p2 = pnand %p1809_p0, %p201_p1  ;;  %s2316_s29 = scalar_lea.vmem %s214_s27, 9216 }
   0x5   : > { %p2317_p7 = scmp.ne.s32.totalorder %s214_s27, %s2316_s29  ;;  %p2324_p10 = scmp.lt.s32.totalorder %s214_s27, %s214_s27 }
   0x6   : > { %p2186_p4 = pneg %p2399_p2  ;;  %p2325_p11 = scmp.lt.s32.totalorder %s2316_s29, %s2316_s29 }
   0x8   : > { %p2187_p5 = pnand %p2190_p3, %p2186_p4  ;;  %p2326_p12 = por %p2325_p11, %p2324_p10 }
   0xa   : > { %p2307_p6 = pneg %p2187_p5 }
   0xc   : > { %p2319_p8 = pnand %p2317_p7, %p2307_p6 }
   0xe   : > { %p2320_p9 = pneg %p2319_p8 }
  0x10   : > { %p2327_p13 = pnand %p2326_p12, %p2320_p9 }
  0x12   : > { %2330 = shalt.err (!%p2327_p13)
}
  0x13   : > { %s2344_s30 = smov 64   ;;  %s2345_s8 = smov 4  }
  0x14   : > { %2189 = dma.hbm_to_vmem [thread:$0]  (!%p2187_p5), %s2691_s1, 9216, %s214_s27, [#allocation4], %s2344_s30, %s2344_s30, %s2345_s8  }
  0x15   : > { %252 = sbr.rel (%p2399_p2) target bundleno = 1441 (0x5a1), region = 48 }
  0x1a   : > { %2336 = dma.done.wait (%p2190_p3), [#allocation4], 9216  }
  0x1b   : > { %2338 = vsyncadd (%p2190_p3), [#allocation4], 4294958080  ;;  %p284_p0 = scmp.lt.s32.totalorder %s2395_s25, 1  ;;  %v2346_v0 = vmov 0.0   ;;  %v2208_v4 = vld [vmem:[#allocation3 + $0x78] sm:$0xff]   ;;  %v2210_v7 = vld [vmem:[#allocation3 + $0x70] sm:$0xff]  }
  0x1c   : > { %2062 = vmatprep.subr.bf16.mxu1 %v2346_v0  ;;  %295 = vst [vmem:[#allocation2] sm:$0xff] %v2346_v0  ;;  %296 = vst [vmem:[#allocation2 + $0x8] sm:$0xff] %v2346_v0  ;;  %v2209_v5 = vld [vmem:[#allocation3 + $0x38] sm:$0xff]   ;;  %1942 = vmatprep.subr.bf16.mxu0 %v2208_v4  ;;  %v2211_v8 = vld [vmem:[#allocation3 + $0x30] sm:$0xff]   ;;  %vm2347_vm0 = vmmov 0   ;;  %vm1723_vm1 = vcmask 130048  }
  0x1d   : > { %297 = vst [vmem:[#allocation2 + $0x20] sm:$0xff] %v2346_v0  ;;  %298 = vst [vmem:[#allocation2 + $0x28] sm:$0xff] %v2346_v0  ;;  %s2700_s25 = smov (!%p284_p0, %s2395_s25), 1  ;;  %1943 = vmatpush3.bf16.msra.mxu0 %v2209_v5  ;;  %v2212_v9 = vld [vmem:[#allocation3 + $0xb8] sm:$0xff]   ;;  %v2213_v10 = vld [vmem:[#allocation3 + $0x68] sm:$0xff]   ;;  %2078 = vmatprep.mubr.msk.bf16.mxu1 %vm2347_vm0, %v2346_v0 }
  0x1e   : > { %s1940_s11 = sshll.u32 %s2700_s25, 7  ;;  %1944 = vmatprep.subr.bf16.mxu0 %v2210_v7  ;;  %2063 = vmatpush3.bf16.msra.mxu1 %v2212_v9  ;;  %v2214_v12 = vld [vmem:[#allocation3 + $0x28] sm:$0xff]   ;;  %v2215_v13 = vld [vmem:[#allocation3 + $0xb0] sm:$0xff]   ;;  %v2216_v14 = vld [vmem:[#allocation3 + $0x60] sm:$0xff]  }
  0x1f   : > { %s2432_s14 = scalar_lea.vmem %s2690_s0, %s1940_s11  ;;  %2064 = vmatprep.subr.bf16.mxu1 %v2346_v0  ;;  %v2218_v16 = vld [vmem:[#allocation3 + $0xa8] sm:$0xff]   ;;  %v2217_v17 = vld [vmem:[#allocation3 + $0x20] sm:$0xff]   ;;  %v2219_v18 = vld [vmem:[#allocation3 + $0x58] sm:$0xff]   ;;  %s2653_s29 = scalar_lea.vmem %s2697_s7, %s1940_s11 }
  0x20   : > { %v299_v1 = vld [vmem:[%s2432_s14] sm:$0xff]  ;;  %v300_v2 = vld [vmem:[%s2432_s14 + $0x8] sm:$0xff]  ;;  %v301_v3 = vld [vmem:[%s2432_s14 + $0x10] sm:$0xff] }
  0x21   : > { %315 = vxpose.xlu0.b32.start [1/16] (narrow) %v299_v1, 16  ;;  %v302_v6 = vld [vmem:[%s2432_s14 + $0x18] sm:$0xff]  ;;  %v303_v11 = vld [vmem:[%s2432_s14 + $0x20] sm:$0xff]  ;;  %1945 = vmatpush3.bf16.msra.mxu0 %v2211_v8  ;;  %v304_v15 = vld [vmem:[%s2432_s14 + $0x28] sm:$0xff] }
  0x22   : > { %1946 = vmatprep.subr.bf16.mxu0 %v2213_v10  ;;  %2065 = vmatpush3.bf16.msra.mxu1 %v2215_v13  ;;  %v305_v19 = vld [vmem:[%s2432_s14 + $0x30] sm:$0xff]  ;;  %v2220_v21 = vld [vmem:[#allocation3 + $0x18] sm:$0xff]   ;;  %v2222_v22 = vld [vmem:[#allocation3 + $0x50] sm:$0xff]  }
  0x23   : > { %2066 = vmatprep.subr.bf16.mxu1 %v2346_v0  ;;  %v2221_v20 = vld [vmem:[#allocation3 + $0xa0] sm:$0xff]   ;;  %v306_v23 = vld [vmem:[%s2432_s14 + $0x38] sm:$0xff]  ;;  %v2224_v24 = vld [vmem:[#allocation3 + $0x98] sm:$0xff]  }
  0x24   : > { %v2223_v25 = vld [vmem:[#allocation3 + $0x10] sm:$0xff]   ;;  %v2225_v26 = vld [vmem:[#allocation3 + $0x48] sm:$0xff]   ;;  %v2228_v30 = vld [vmem:[#allocation3 + $0x40] sm:$0xff]  }
  0x25   : > { %316 = vxpose.xlu0.b32.cont [2/16] (narrow) %v300_v2, 16  ;;  %1947 = vmatpush3.bf16.msra.mxu0 %v2214_v12  ;;  %v2227_v27 = vld [vmem:[#allocation3 + $0x90] sm:$0xff]   ;;  %v2226_v29 = vld [vmem:[#allocation3 + $0x8] sm:$0xff]   ;;  %v308_v31 = vld [vmem:[%s2432_s14 + $0x48] sm:$0xff] }
  0x26   : > { %1948 = vmatprep.subr.bf16.mxu0 %v2216_v14  ;;  %2067 = vmatpush3.bf16.msra.mxu1 %v2218_v16  ;;  %v307_v28 = vld [vmem:[%s2432_s14 + $0x40] sm:$0xff]  ;;  %v2230_v32 = vld [vmem:[#allocation3 + $0x88] sm:$0xff]   ;;  %v2229_v33 = vld [vmem:[#allocation3] sm:$0xff]  }
  0x27   : > { %2068 = vmatprep.subr.bf16.mxu1 %v2346_v0  ;;  %v2231_v34 = vld [vmem:[#allocation3 + $0x80] sm:$0xff]   ;;  %v310_v36 = vld [vmem:[%s2432_s14 + $0x58] sm:$0xff]  ;;  %v311_v37 = vld [vmem:[%s2432_s14 + $0x60] sm:$0xff] }
  0x28   : > { %v309_v35 = vld [vmem:[%s2432_s14 + $0x50] sm:$0xff]  ;;  %v312_v38 = vld [vmem:[%s2432_s14 + $0x68] sm:$0xff]  ;;  %v314_v40 = vld [vmem:[%s2432_s14 + $0x78] sm:$0xff] }
  0x29   : > { %317 = vxpose.xlu0.b32.cont [3/16] (narrow) %v301_v3, 16  ;;  %1949 = vmatpush3.bf16.msra.mxu0 %v2217_v17  ;;  %v313_v39 = vld [vmem:[%s2432_s14 + $0x70] sm:$0xff]  ;;  %v352_v46 = vld [vmem:[#allocation2 + $0x7] sm:$0xff]  ;;  %v2232_v48 = vld [vmem:[%s2693_s3 + $0x38] sm:$0xff]  }
  0x2a   : > { %1950 = vmatprep.subr.bf16.mxu0 %v2219_v18  ;;  %2069 = vmatpush3.bf16.msra.mxu1 %v2221_v20  ;;  %v356_v50 = vld [vmem:[#allocation2 + $0x21] sm:$0xff]  ;;  %v2233_v52 = vld [vmem:[%s2693_s3 + $0x30] sm:$0xff]   ;;  %v2236_v56 = vld [vmem:[%s2693_s3 + $0x18] sm:$0xff]  }
  0x2b   : > { %2070 = vmatprep.subr.bf16.mxu1 %v2346_v0  ;;  %v2234_v54 = vld [vmem:[%s2693_s3 + $0x28] sm:$0xff]   ;;  %v2235_v55 = vld [vmem:[%s2693_s3 + $0x20] sm:$0xff]   ;;  %v2237_v57 = vld [vmem:[%s2693_s3 + $0x10] sm:$0xff]  }
  0x2c   : > { %v2238_v58 = vld [vmem:[%s2693_s3 + $0x8] sm:$0xff]   ;;  %v2239_v59 = vld [vmem:[%s2693_s3] sm:$0xff]   ;;  %v2246_v1 = vld [vmem:[#allocation3 + $0x128] sm:$0xff]  }
  0x2d   : > { %318 = vxpose.xlu0.b32.cont [4/16] (narrow) %v302_v6, 16  ;;  %1951 = vmatpush3.bf16.msra.mxu0 %v2220_v21  ;;  %v2240_v60 = vld [vmem:[#allocation3 + $0x138] sm:$0xff]   ;;  %v2243_v62 = vld [vmem:[#allocation3 + $0x130] sm:$0xff]   ;;  %v2247_v2 = vld [vmem:[#allocation3 + $0xe8] sm:$0xff]  }
  0x2e   : > { %1952 = vmatprep.subr.bf16.mxu0 %v2222_v22  ;;  %2071 = vmatpush3.bf16.msra.mxu1 %v2224_v24  ;;  %v2241_v61 = vld [vmem:[#allocation3 + $0xf8] sm:$0xff]   ;;  %v2244_v63 = vld [vmem:[#allocation3 + $0xf0] sm:$0xff]   ;;  %v2249_v24 = vld [vmem:[#allocation3 + $0x120] sm:$0xff]  }
  0x2f   : > { %2072 = vmatprep.subr.bf16.mxu1 %v2346_v0  ;;  %v1818_v5 = vld [vmem:[%s2692_s2] ss:$0 sm:$0xff]  ;;  %v2242_v20 = vld [vmem:[#allocation3 + $0x178] sm:$0xff]  }
  0x30   : > { %v2245_v22 = vld [vmem:[#allocation3 + $0x170] sm:$0xff]  }
  0x31   : > { %319 = vxpose.xlu0.b32.cont [5/16] (narrow) %v303_v11, 16  ;;  %1953 = vmatpush3.bf16.msra.mxu0 %v2223_v25  ;;  %v2250_v25 = vld [vmem:[#allocation3 + $0xe0] sm:$0xff]  }
  0x32   : > { %1954 = vmatprep.subr.bf16.mxu0 %v2225_v26  ;;  %2073 = vmatpush3.bf16.msra.mxu1 %v2227_v27  ;;  %v2251_v26 = vld [vmem:[#allocation3 + $0x160] sm:$0xff]   ;;  %v2252_v27 = vld [vmem:[#allocation3 + $0x118] sm:$0xff]  }
  0x33   : > { %2074 = vmatprep.subr.bf16.mxu1 %v2346_v0 }
  0x35   : > { %320 = vxpose.xlu0.b32.cont [6/16] (narrow) %v304_v15, 16  ;;  %1955 = vmatpush3.bf16.msra.mxu0 %v2226_v29  ;;  %v2254_v29 = vld [vmem:[#allocation3 + $0x158] sm:$0xff]  }
  0x36   : > { %1956 = vmatprep.subr.bf16.mxu0 %v2228_v30  ;;  %2075 = vmatpush3.bf16.msra.mxu1 %v2230_v32  ;;  %v2255_v30 = vld [vmem:[#allocation3 + $0x110] sm:$0xff]  }
  0x37   : > { %2076 = vmatprep.subr.bf16.mxu1 %v2346_v0  ;;  %v2257_v32 = vld [vmem:[#allocation3 + $0x150] sm:$0xff]  }
  0x39   : > { %321 = vxpose.xlu0.b32.cont [7/16] (narrow) %v305_v19, 16  ;;  %1957 = vmatpush3.bf16.msra.mxu0 %v2229_v33  ;;  %v2258_v33 = vld [vmem:[#allocation3 + $0x108] sm:$0xff]  }
  0x3a   : > { %2082 = vmatprep.subr.bf16.mxu0 %v2346_v0  ;;  %2077 = vmatpush3.bf16.msra.mxu1 %v2231_v34  ;;  %v2259_v34 = vld [vmem:[#allocation3 + $0xc8] sm:$0xff]  }
  0x3b   : > { %1982 = vmatprep.subr.bf16.mxu1 %v2240_v60  ;;  %v2267_v60 = vld [vmem:[%s2693_s3 + $0x60] sm:$0xff]  }
  0x3d   : > { %322 = vxpose.xlu0.b32.cont [8/16] (narrow) %v306_v23, 16  ;;  %v2248_v23 = vld [vmem:[#allocation3 + $0x168] sm:$0xff]  }
  0x41   : > { %323 = vxpose.xlu0.b32.cont [9/16] (narrow) %v307_v28, 16  ;;  %v2253_v28 = vld [vmem:[#allocation3 + $0xd8] sm:$0xff]  }
  0x45   : > { %324 = vxpose.xlu0.b32.cont [10/16] (narrow) %v308_v31, 16  ;;  %v2256_v31 = vld [vmem:[#allocation3 + $0xd0] sm:$0xff]  }
  0x49   : > { %325 = vxpose.xlu0.b32.cont [11/16] (narrow) %v309_v35, 16  ;;  %v2260_v35 = vld [vmem:[#allocation3 + $0x148] sm:$0xff]  }
  0x4d   : > { %326 = vxpose.xlu0.b32.cont [12/16] (narrow) %v310_v36, 16  ;;  %v2261_v36 = vld [vmem:[#allocation3 + $0x100] sm:$0xff]  }
  0x51   : > { %327 = vxpose.xlu0.b32.cont [13/16] (narrow) %v311_v37, 16  ;;  %v2262_v37 = vld [vmem:[#allocation3 + $0xc0] sm:$0xff]  }
  0x55   : > { %328 = vxpose.xlu0.b32.cont [14/16] (narrow) %v312_v38, 16  ;;  %v2263_v38 = vld [vmem:[#allocation3 + $0x140] sm:$0xff]  }
  0x59   : > { %329 = vxpose.xlu0.b32.cont [15/16] (narrow) %v313_v39, 16  ;;  %v1843_v39 = vld [vmem:[%s2694_s4] ss:$0 sm:$0xff] }
  0x5d   : > { %330 = vxpose.xlu0.b32.end [16/16] (narrow) %v314_v40, 16 }
  0x9d   : > { %v2460_v41 = vpop.trf.xlu0 }
  0x9e   : > { %v347_v42 = vmax.f32 %v2460_v41, 0.0 }
  0xa0   : > { %350 = vst [vmem:[#allocation2 + $0x10] sm:$0xff] %v347_v42 }
  0xa1   : > { %v2463_v43 = vpop.trf.xlu0 }
  0xa2   : > { %v348_v44 = vmax.f32 %v2463_v43, 0.0 }
  0xa4   : > { %351 = vst [vmem:[#allocation2 + $0x18] sm:$0xff] %v348_v44  ;;  %v349_v45 = vpack.c.bf16 %v348_v44, %v347_v42 }
  0xa6   : > { %589 = vmatprep.mubr.bf16.mxu0 %v349_v45 }
  0xa7   : > { %v353_v47 = vld [vmem:[#allocation2 + $0xf] sm:$0xff] }
  0xa8   : > { %v354_v49 = vpack.c.bf16 %v353_v47, %v352_v46 }
  0xaa   : > { %590 = vmatmul.mubr.bf16.vlgmr.msra.gmra.mxu0 %v354_v49 }
  0xab   : > { %v355_v51 = vld [vmem:[#allocation2 + $0x19] sm:$0xff]  ;;  %2083 = vmatpush3.bf16.msra.mxu0 %v2232_v48  ;;  %2098 = vmatprep.mubr.msk.bf16.mxu0 %vm2347_vm0, %v2346_v0 }
  0xac   : > { %v357_v53 = vpack.c.bf16 %v356_v50, %v355_v51  ;;  %2084 = vmatprep.subr.bf16.mxu0 %v2346_v0 }
  0xae   : > { %2079 = vmatmul.mubr.bf16.vlgmr.msra.gmra.mxu1 %v357_v53 }
  0xaf   : > { %2085 = vmatpush3.bf16.msra.mxu0 %v2233_v52  ;;  %1983 = vmatpush3.bf16.msra.mxu1 %v2241_v61  ;;  %v2268_v61 = vld [vmem:[%s2693_s3 + $0x58] sm:$0xff]  }
  0xb0   : > { %2086 = vmatprep.subr.bf16.mxu0 %v2346_v0  ;;  %1984 = vmatprep.subr.bf16.mxu1 %v2243_v62  ;;  %v2269_v62 = vld [vmem:[%s2693_s3 + $0x50] sm:$0xff]  }
  0xb3   : > { %2087 = vmatpush3.bf16.msra.mxu0 %v2234_v54  ;;  %1985 = vmatpush3.bf16.msra.mxu1 %v2244_v63  ;;  %v2270_v63 = vld [vmem:[%s2693_s3 + $0x48] sm:$0xff]  }
  0xb4   : > { %2088 = vmatprep.subr.bf16.mxu0 %v2346_v0  ;;  %1986 = vmatprep.subr.bf16.mxu1 %v2246_v1  ;;  %v2271_v1 = vld [vmem:[%s2693_s3 + $0x40] sm:$0xff]  }
  0xb7   : > { %2089 = vmatpush3.bf16.msra.mxu0 %v2235_v55  ;;  %1987 = vmatpush3.bf16.msra.mxu1 %v2247_v2  ;;  %v2272_v2 = vld [vmem:[#allocation3 + $0x1f8] sm:$0xff]  }
  0xb8   : > { %2090 = vmatprep.subr.bf16.mxu0 %v2346_v0  ;;  %1988 = vmatprep.subr.bf16.mxu1 %v2249_v24 }
  0xbb   : > { %2091 = vmatpush3.bf16.msra.mxu0 %v2236_v56  ;;  %1989 = vmatpush3.bf16.msra.mxu1 %v2250_v25  ;;  %v2274_v25 = vld [vmem:[#allocation3 + $0x238] sm:$0xff]  }
  0xbc   : > { %2092 = vmatprep.subr.bf16.mxu0 %v2346_v0  ;;  %1990 = vmatprep.subr.bf16.mxu1 %v2252_v27  ;;  %v2277_v27 = vld [vmem:[#allocation3 + $0x230] sm:$0xff]  }
  0xbf   : > { %2093 = vmatpush3.bf16.msra.mxu0 %v2237_v57  ;;  %1991 = vmatpush3.bf16.msra.mxu1 %v2253_v28  ;;  %v2280_v28 = vld [vmem:[#allocation3 + $0x228] sm:$0xff]  }
  0xc0   : > { %2094 = vmatprep.subr.bf16.mxu0 %v2346_v0  ;;  %1992 = vmatprep.subr.bf16.mxu1 %v2255_v30  ;;  %v2282_v30 = vld [vmem:[#allocation3 + $0x1a0] sm:$0xff]  }
  0xc3   : > { %2095 = vmatpush3.bf16.msra.mxu0 %v2238_v58  ;;  %1993 = vmatpush3.bf16.msra.mxu1 %v2256_v31  ;;  %v2283_v31 = vld [vmem:[#allocation3 + $0x220] sm:$0xff]  }
  0xc4   : > { %2096 = vmatprep.subr.bf16.mxu0 %v2346_v0  ;;  %1994 = vmatprep.subr.bf16.mxu1 %v2258_v33  ;;  %v2285_v33 = vld [vmem:[#allocation3 + $0x198] sm:$0xff]  }
  0xc7   : > { %2097 = vmatpush3.bf16.msra.mxu0 %v2239_v59  ;;  %1995 = vmatpush3.bf16.msra.mxu1 %v2259_v34  ;;  %v2266_v59 = vld [vmem:[%s2693_s3 + $0x68] sm:$0xff]  }
  0xc8   : > { %2102 = vmatprep.subr.bf16.mxu0 %v2346_v0  ;;  %1996 = vmatprep.subr.bf16.mxu1 %v2261_v36  ;;  %v2286_v34 = vld [vmem:[#allocation3 + $0x218] sm:$0xff]   ;;  %v2288_v36 = vld [vmem:[#allocation3 + $0x190] sm:$0xff]  }
  0xcb   : > { %1997 = vmatpush3.bf16.msra.mxu1 %v2262_v37  ;;  %v2289_v37 = vld [vmem:[#allocation3 + $0x210] sm:$0xff]  }
  0xcc   : > { %2122 = vmatprep.subr.bf16.mxu1 %v2346_v0 }
 0x16a   : > { %v1958_v3 = vpop.f32.mrf.mxu0 }
 0x16c   : > { %v1959_v4 = vpop.f32.mrf.mxu0 }
 0x16d   : > { %v1960_v6 = vadd.f32 %v1959_v4, %v1958_v3  ;;  %v2273_v3 = vld [vmem:[#allocation3 + $0x1b8] sm:$0xff]   ;;  %v2275_v4 = vld [vmem:[#allocation3 + $0x1f0] sm:$0xff]  }
 0x16e   : > { %v1961_v7 = vpop.f32.mrf.mxu0  ;;  %v632_v8 = vpop.f32.mrf.mxu1 }
 0x16f   : > { %v592_v9 = vadd.f32 %v1960_v6, %v1818_v5  ;;  %v2278_v6 = vld [vmem:[#allocation3 + $0x1e8] sm:$0xff]  }
 0x170   : > { %v1962_v10 = vpop.f32.mrf.mxu0  ;;  %v2080_v11 = vpop.f32.mrf.mxu1 }
 0x171   : > { %v1963_v12 = vadd.f32 %v1962_v10, %v1961_v7  ;;  %v633_v14 = vadd.f32 %v632_v8, %v592_v9  ;;  %v2279_v7 = vld [vmem:[#allocation3 + $0x1a8] sm:$0xff]   ;;  %v1853_v10 = vld [vmem:[%s2692_s2 + $0x1] ss:$0 sm:$0xff] }
 0x172   : > { %v635_v13 = vpop.f32.mrf.mxu1 }
 0x173   : > { %v595_v15 = vadd.f32 %v1963_v12, %v1818_v5  ;;  %v639_v18 = vmax.f32 %v633_v14, 0.0  ;;  %v2276_v5 = vld [vmem:[#allocation3 + $0x1b0] sm:$0xff]  }
 0x174   : > { %v2081_v16 = vpop.f32.mrf.mxu1 }
 0x175   : > { %v636_v17 = vadd.f32 %v635_v13, %v595_v15 }
 0x177   : > { %v640_v19 = vmax.f32 %v636_v17, 0.0 }
 0x179   : > { %v641_v21 = vpack.c.bf16 %v640_v19, %v639_v18 }
 0x17b   : > { %2099 = vmatmul.mubr.bf16.vlgmr.msra.gmra.mxu0 %v641_v21 }
 0x17c   : > { %2103 = vmatpush3.bf16.msra.mxu0 %v2242_v20  ;;  %2118 = vmatprep.mubr.msk.bf16.mxu0 %vm2347_vm0, %v2346_v0 }
 0x17d   : > { %2104 = vmatprep.subr.bf16.mxu0 %v2346_v0 }
 0x180   : > { %2105 = vmatpush3.bf16.msra.mxu0 %v2245_v22 }
 0x181   : > { %2106 = vmatprep.subr.bf16.mxu0 %v2346_v0 }
 0x184   : > { %2107 = vmatpush3.bf16.msra.mxu0 %v2248_v23 }
 0x185   : > { %2108 = vmatprep.subr.bf16.mxu0 %v2346_v0 }
 0x188   : > { %2109 = vmatpush3.bf16.msra.mxu0 %v2251_v26 }
 0x189   : > { %2110 = vmatprep.subr.bf16.mxu0 %v2346_v0 }
 0x18c   : > { %2111 = vmatpush3.bf16.msra.mxu0 %v2254_v29  ;;  %v2281_v29 = vld [vmem:[#allocation3 + $0x1e0] sm:$0xff]  }
 0x18d   : > { %2112 = vmatprep.subr.bf16.mxu0 %v2346_v0 }
 0x190   : > { %2113 = vmatpush3.bf16.msra.mxu0 %v2257_v32  ;;  %v2284_v32 = vld [vmem:[#allocation3 + $0x1d8] sm:$0xff]  }
 0x191   : > { %2114 = vmatprep.subr.bf16.mxu0 %v2346_v0 }
 0x194   : > { %2115 = vmatpush3.bf16.msra.mxu0 %v2260_v35  ;;  %v2287_v35 = vld [vmem:[#allocation3 + $0x1d0] sm:$0xff]  }
 0x195   : > { %2116 = vmatprep.subr.bf16.mxu0 %v2346_v0 }
 0x198   : > { %2117 = vmatpush3.bf16.msra.mxu0 %v2263_v38  ;;  %v2290_v38 = vld [vmem:[#allocation3 + $0x1c8] sm:$0xff]  }
 0x199   : > { %2022 = vmatprep.subr.bf16.mxu0 %v2272_v2 }
 0x23b   : > { %v747_v40 = vpop.f32.mrf.mxu0 }
 0x23c   : > { %v748_v42 = vadd.f32 %v1843_v39, %v747_v40  ;;  %v2291_v40 = vld [vmem:[#allocation3 + $0x188] sm:$0xff]  }
 0x23d   : > { %v2100_v44 = vpop.f32.mrf.mxu0 }
 0x23e   : > { %v2517_v45 = vadd.f32 %v748_v42, %v2460_v41  ;;  %v2264_v41 = vld [vmem:[%s2693_s3 + $0x78] sm:$0xff]   ;;  %v2293_v44 = vld [vmem:[#allocation3 + $0x1c0] sm:$0xff]  }
 0x23f   : > { %v750_v46 = vpop.f32.mrf.mxu0  ;;  %v2292_v42 = vld [vmem:[#allocation3 + $0x208] sm:$0xff]  }
 0x240   : > { %v756_v47 = vmax.f32 %v2517_v45, 0.0  ;;  %v751_v48 = vadd.f32 %v1843_v39, %v750_v46  ;;  %v2304_v39 = vld [vmem:[#allocation2] sm:$0xff]  ;;  %v2294_v46 = vld [vmem:[#allocation3 + $0x180] sm:$0xff]  }
 0x241   : > { %v2101_v49 = vpop.f32.mrf.mxu0 }
 0x242   : > { %759 = vst [vmem:[#allocation2 + $0x10] sm:$0xff] %v756_v47  ;;  %v2521_v50 = vadd.f32 %v751_v48, %v2463_v43  ;;  %v2265_v43 = vld [vmem:[%s2693_s3 + $0x70] sm:$0xff]   ;;  %v2348_v48 = vmov 0   ;;  %v1483_v49 = vld [vmem:[%s2696_s6 + $0x8] sm:$0xff] }
 0x243   : > { %2206 = vset.pattern.permute.xlu1 %v2348_v48  ;;  %2207 = vset.pattern.permute.xlu0 %v2348_v48 }
 0x244   : > { %v757_v51 = vmax.f32 %v2521_v50, 0.0 }
 0x246   : > { %760 = vst [vmem:[#allocation2 + $0x18] sm:$0xff] %v757_v51  ;;  %v758_v52 = vpack.c.bf16 %v757_v51, %v756_v47  ;;  %v2295_v47 = vld [vmem:[#allocation3 + $0x200] sm:$0xff]  }
 0x247   : > { %v1484_v51 = vld [vmem:[%s2696_s6 + $0x10] sm:$0xff] }
 0x248   : > { %1000 = vmatprep.mubr.bf16.mxu1 %v758_v52  ;;  %v1895_v52 = vld [vmem:[%s2694_s4 + $0x1] ss:$0 sm:$0xff] }
 0x249   : > { %v761_v53 = vld [vmem:[#allocation2 + $0xd] sm:$0xff] }
 0x24d   : > { %v762_v54 = vld [vmem:[#allocation2 + $0x15] sm:$0xff] }
 0x24e   : > { %v764_v55 = vld [vmem:[#allocation2 + $0x13] sm:$0xff]  ;;  %v765_v56 = vld [vmem:[#allocation2 + $0x1b] sm:$0xff]  ;;  %v763_v57 = vpack.c.bf16 %v762_v54, %v761_v53 }
 0x24f   : > { %v766_v58 = vpack.c.bf16 %v765_v56, %v764_v55 }
 0x250   : > { %1001 = vmatmul.mubr.bf16.vlgmr.msra.gmra.mxu1 %v763_v57 }
 0x251   : > { %2119 = vmatmul.mubr.bf16.vlgmr.msra.gmra.mxu0 %v766_v58  ;;  %2123 = vmatpush3.bf16.msra.mxu1 %v2264_v41 }
 0x252   : > { %2138 = vmatprep.mubr.msk.bf16.mxu1 %vm2347_vm0, %v2346_v0  ;;  %2124 = vmatprep.subr.bf16.mxu1 %v2346_v0 }
 0x253   : > { %2023 = vmatpush3.bf16.msra.mxu0 %v2273_v3 }
 0x254   : > { %2024 = vmatprep.subr.bf16.mxu0 %v2275_v4 }
 0x255   : > { %2125 = vmatpush3.bf16.msra.mxu1 %v2265_v43 }
 0x256   : > { %2126 = vmatprep.subr.bf16.mxu1 %v2346_v0 }
 0x257   : > { %2025 = vmatpush3.bf16.msra.mxu0 %v2276_v5  ;;  %v1487_v5 = vld [vmem:[%s2696_s6 + $0x28] sm:$0xff] }
 0x258   : > { %2026 = vmatprep.subr.bf16.mxu0 %v2278_v6  ;;  %v1488_v6 = vld [vmem:[%s2696_s6 + $0x30] sm:$0xff] }
 0x259   : > { %2127 = vmatpush3.bf16.msra.mxu1 %v2266_v59 }
 0x25a   : > { %2128 = vmatprep.subr.bf16.mxu1 %v2346_v0 }
 0x25b   : > { %2027 = vmatpush3.bf16.msra.mxu0 %v2279_v7  ;;  %v1489_v7 = vld [vmem:[%s2696_s6 + $0x38] sm:$0xff] }
 0x25c   : > { %2028 = vmatprep.subr.bf16.mxu0 %v2281_v29 }
 0x25d   : > { %2129 = vmatpush3.bf16.msra.mxu1 %v2267_v60 }
 0x25e   : > { %2130 = vmatprep.subr.bf16.mxu1 %v2346_v0 }
 0x25f   : > { %2029 = vmatpush3.bf16.msra.mxu0 %v2282_v30 }
 0x260   : > { %2030 = vmatprep.subr.bf16.mxu0 %v2284_v32 }
 0x261   : > { %2131 = vmatpush3.bf16.msra.mxu1 %v2268_v61 }
 0x262   : > { %2132 = vmatprep.subr.bf16.mxu1 %v2346_v0 }
 0x263   : > { %2031 = vmatpush3.bf16.msra.mxu0 %v2285_v33 }
 0x264   : > { %2032 = vmatprep.subr.bf16.mxu0 %v2287_v35 }
 0x265   : > { %2133 = vmatpush3.bf16.msra.mxu1 %v2269_v62 }
 0x266   : > { %2134 = vmatprep.subr.bf16.mxu1 %v2346_v0 }
 0x267   : > { %2033 = vmatpush3.bf16.msra.mxu0 %v2288_v36  ;;  %v2298_v36 = vld [vmem:[%s2695_s5 + $0x8] sm:$0xff]  }
 0x268   : > { %2034 = vmatprep.subr.bf16.mxu0 %v2290_v38  ;;  %v2300_v38 = vld [vmem:[%s2695_s5 + $0x10] sm:$0xff]  }
 0x269   : > { %2135 = vmatpush3.bf16.msra.mxu1 %v2270_v63 }
 0x26a   : > { %2136 = vmatprep.subr.bf16.mxu1 %v2346_v0 }
 0x26b   : > { %2035 = vmatpush3.bf16.msra.mxu0 %v2291_v40  ;;  %v2302_v40 = vld [vmem:[%s2695_s5 + $0x18] sm:$0xff]  }
 0x26c   : > { %2036 = vmatprep.subr.bf16.mxu0 %v2293_v44 }
 0x26d   : > { %2137 = vmatpush3.bf16.msra.mxu1 %v2271_v1 }
 0x26e   : > { %2142 = vmatprep.subr.bf16.mxu1 %v2346_v0 }
 0x26f   : > { %2037 = vmatpush3.bf16.msra.mxu0 %v2294_v46 }
 0x310   : > { %v1998_v8 = vpop.f32.mrf.mxu1 }
 0x311   : > { %v1043_v9 = vpop.f32.mrf.mxu0 }
 0x312   : > { %v1999_v11 = vpop.f32.mrf.mxu1 }
 0x313   : > { %v2120_v12 = vpop.f32.mrf.mxu0  ;;  %v2000_v13 = vadd.f32 %v1999_v11, %v1998_v8  ;;  %v1490_v8 = vld [vmem:[%s2696_s6 + $0x40] sm:$0xff]  ;;  %v1491_v11 = vld [vmem:[%s2696_s6 + $0x48] sm:$0xff] }
 0x314   : > { %v2001_v14 = vpop.f32.mrf.mxu1  ;;  %v1492_v12 = vld [vmem:[%s2696_s6 + $0x50] sm:$0xff] }
 0x315   : > { %v1046_v15 = vpop.f32.mrf.mxu0  ;;  %v1003_v16 = vadd.f32 %v2000_v13, %v1853_v10  ;;  %v1493_v13 = vld [vmem:[%s2696_s6 + $0x58] sm:$0xff] }
 0x316   : > { %v2002_v17 = vpop.f32.mrf.mxu1 }
 0x317   : > { %v2121_v18 = vpop.f32.mrf.mxu0  ;;  %v2003_v19 = vadd.f32 %v2002_v17, %v2001_v14  ;;  %v1044_v20 = vadd.f32 %v1043_v9, %v1003_v16  ;;  %v2296_v9 = vld [vmem:[%s2695_s5] sm:$0xff]   ;;  %v1496_v16 = vld [vmem:[%s2696_s6 + $0x70] sm:$0xff]  ;;  %v1497_v17 = vld [vmem:[%s2696_s6 + $0x78] sm:$0xff] }
 0x318   : > { %v1494_v14 = vld [vmem:[%s2696_s6 + $0x60] sm:$0xff] }
 0x319   : > { %v1006_v21 = vadd.f32 %v2003_v19, %v1853_v10  ;;  %v1050_v23 = vmax.f32 %v1044_v20, 0.0  ;;  %v2297_v10 = vld [vmem:[%s2695_s5 + $0x20] sm:$0xff]  }
 0x31a   : > { %v1905_v20 = vld [vmem:[%s2692_s2 + $0x2] ss:$0 sm:$0xff] }
 0x31b   : > { %v1047_v22 = vadd.f32 %v1046_v15, %v1006_v21  ;;  %v1495_v15 = vld [vmem:[%s2696_s6 + $0x68] sm:$0xff] }
 0x31d   : > { %v1051_v24 = vmax.f32 %v1047_v22, 0.0 }
 0x31f   : > { %v1052_v26 = vpack.c.bf16 %v1051_v24, %v1050_v23 }
 0x321   : > { %2139 = vmatmul.mubr.bf16.vlgmr.msra.gmra.mxu1 %v1052_v26 }
 0x322   : > { %2143 = vmatpush3.bf16.msra.mxu1 %v2274_v25  ;;  %2158 = vmatprep.mubr.msk.bf16.mxu1 %vm2347_vm0, %v2346_v0 }
 0x323   : > { %2144 = vmatprep.subr.bf16.mxu1 %v2346_v0 }
 0x326   : > { %2145 = vmatpush3.bf16.msra.mxu1 %v2277_v27 }
 0x327   : > { %2146 = vmatprep.subr.bf16.mxu1 %v2346_v0 }
 0x32a   : > { %2147 = vmatpush3.bf16.msra.mxu1 %v2280_v28 }
 0x32b   : > { %2148 = vmatprep.subr.bf16.mxu1 %v2346_v0 }
 0x32e   : > { %2149 = vmatpush3.bf16.msra.mxu1 %v2283_v31 }
 0x32f   : > { %2150 = vmatprep.subr.bf16.mxu1 %v2346_v0 }
 0x332   : > { %2151 = vmatpush3.bf16.msra.mxu1 %v2286_v34 }
 0x333   : > { %2152 = vmatprep.subr.bf16.mxu1 %v2346_v0  ;;  %v1482_v0 = vld [vmem:[%s2696_s6] sm:$0xff] }
 0x334   : > { %1500 = vperm.xlu1 %2206, %v1482_v0  }
 0x336   : > { %2153 = vmatpush3.bf16.msra.mxu1 %v2289_v37  ;;  %v2299_v37 = vld [vmem:[%s2695_s5 + $0x28] sm:$0xff]  }
 0x337   : > { %2154 = vmatprep.subr.bf16.mxu1 %v2304_v39 }
 0x338   : > { %1505 = vperm.xlu1 %2206, %v1483_v49  }
 0x33a   : > { %2155 = vmatpush3.bf16.msra.mxu1 %v2292_v42  ;;  %v2303_v42 = vld [vmem:[%s2695_s5 + $0x38] sm:$0xff]  }
 0x33b   : > { %2156 = vmatprep.subr.bf16.mxu1 %v2304_v39  ;;  %v2301_v39 = vld [vmem:[%s2695_s5 + $0x30] sm:$0xff]  }
 0x33c   : > { %1510 = vperm.xlu1 %2206, %v1484_v51  }
 0x33e   : > { %2157 = vmatpush3.bf16.msra.mxu1 %v2295_v47 }
 0x3af   : > { %v1501_v44 = vpop.permute.xlu1 %1500 }
 0x3b3   : > { %v1506_v46 = vpop.permute.xlu1 %1505 }
 0x3b7   : > { %v1511_v47 = vpop.permute.xlu1 %1510 }
 0x3e1   : > { %v1160_v53 = vpop.f32.mrf.mxu1 }
 0x3e2   : > { %v1161_v41 = vadd.f32 %v1895_v52, %v1160_v53 }
 0x3e3   : > { %v2140_v54 = vpop.f32.mrf.mxu1 }
 0x3e4   : > { %v1167_v55 = vadd.f32 %v1161_v41, %v2517_v45  ;;  %v1485_v45 = vld [vmem:[%s2696_s6 + $0x18] sm:$0xff] }
 0x3e5   : > { %v1163_v56 = vpop.f32.mrf.mxu1  ;;  %1515 = vperm.xlu1 %2206, %v1485_v45  }
 0x3e6   : > { %v1169_v57 = vmax.f32 %v1167_v55, 0.0  ;;  %v1164_v58 = vadd.f32 %v1895_v52, %v1163_v56 }
 0x3e7   : > { %v2141_v43 = vpop.f32.mrf.mxu1 }
 0x3e8   : > { %1172 = vst [vmem:[#allocation2 + $0x10] sm:$0xff] %v1169_v57  ;;  %v1168_v59 = vadd.f32 %v1164_v58, %v2521_v50  ;;  %v1486_v50 = vld [vmem:[%s2696_s6 + $0x20] sm:$0xff] }
 0x3e9   : > { %1520 = vperm.xlu1 %2206, %v1486_v50  }
 0x3ea   : > { %v1170_v60 = vmax.f32 %v1168_v59, 0.0 }
 0x3ec   : > { %1173 = vst [vmem:[#allocation2 + $0x18] sm:$0xff] %v1170_v60  ;;  %v1171_v61 = vpack.c.bf16 %v1170_v60, %v1169_v57 }
 0x3ed   : > { %1525 = vperm.xlu1 %2206, %v1487_v5  }
 0x3ee   : > { %1413 = vmatprep.mubr.bf16.mxu0 %v1171_v61 }
 0x3ef   : > { %v1174_v62 = vld [vmem:[#allocation2 + $0xf] sm:$0xff] }
 0x3f1   : > { %1530 = vperm.xlu1 %2206, %v1488_v6  }
 0x3f3   : > { %v1175_v63 = vld [vmem:[#allocation2 + $0x17] sm:$0xff] }
 0x3f4   : > { %v1177_v1 = vld [vmem:[#allocation2 + $0x11] sm:$0xff]  ;;  %v1178_v2 = vld [vmem:[#allocation2 + $0x19] sm:$0xff]  ;;  %v1176_v3 = vpack.c.bf16 %v1175_v63, %v1174_v62 }
 0x3f5   : > { %v1179_v4 = vpack.c.bf16 %v1178_v2, %v1177_v1  ;;  %1535 = vperm.xlu1 %2206, %v1489_v7  }
 0x3f6   : > { %1414 = vmatmul.mubr.bf16.vlgmr.msra.gmra.mxu0 %v1176_v3 }
 0x3f7   : > { %2159 = vmatmul.mubr.bf16.vlgmr.msra.gmra.mxu1 %v1179_v4  ;;  %2164 = vmatprep.mubr.bf16.mxu0 %v2296_v9 }
 0x3f8   : > { %2172 = vmatprep.mubr.bf16.mxu1 %v2297_v10 }
 0x3f9   : > { %1540 = vperm.xlu1 %2206, %v1490_v8  }
 0x3fd   : > { %1545 = vperm.xlu1 %2206, %v1491_v11  }
 0x401   : > { %1550 = vperm.xlu1 %2206, %v1492_v12  }
 0x405   : > { %1555 = vperm.xlu1 %2206, %v1493_v13  }
 0x409   : > { %1560 = vperm.xlu1 %2206, %v1494_v14  }
 0x40d   : > { %1565 = vperm.xlu1 %2206, %v1495_v15  }
 0x411   : > { %1570 = vperm.xlu1 %2206, %v1496_v16  }
 0x415   : > { %1575 = vperm.xlu1 %2206, %v1497_v17  }
 0x460   : > { %v1516_v0 = vpop.permute.xlu1 %1515 }
 0x464   : > { %v1521_v48 = vpop.permute.xlu1 %1520 }
 0x468   : > { %v1526_v49 = vpop.permute.xlu1 %1525 }
 0x46c   : > { %v1531_v51 = vpop.permute.xlu1 %1530 }
 0x470   : > { %v1536_v52 = vpop.permute.xlu1 %1535 }
 0x474   : > { %v1541_v53 = vpop.permute.xlu1 %1540 }
 0x478   : > { %v1546_v41 = vpop.permute.xlu1 %1545 }
 0x47c   : > { %v1551_v54 = vpop.permute.xlu1 %1550 }
 0x480   : > { %v1556_v55 = vpop.permute.xlu1 %1555 }
 0x484   : > { %v1561_v56 = vpop.permute.xlu1 %1560 }
 0x488   : > { %v1566_v57 = vpop.permute.xlu1 %1565 }
 0x48c   : > { %v1571_v4 = vpop.permute.xlu1 %1570 }
 0x490   : > { %v1576_v15 = vpop.permute.xlu1 %1575 }
 0x4b6   : > { %v2038_v18 = vpop.f32.mrf.mxu0 }
 0x4b7   : > { %v1456_v19 = vpop.f32.mrf.mxu1 }
 0x4b8   : > { %v2039_v21 = vpop.f32.mrf.mxu0 }
 0x4b9   : > { %v2160_v22 = vpop.f32.mrf.mxu1  ;;  %v2040_v23 = vadd.f32 %v2039_v21, %v2038_v18 }
 0x4ba   : > { %v2041_v24 = vpop.f32.mrf.mxu0 }
 0x4bb   : > { %v1459_v25 = vpop.f32.mrf.mxu1  ;;  %v1416_v26 = vadd.f32 %v2040_v23, %v1905_v20 }
 0x4bc   : > { %v2042_v27 = vpop.f32.mrf.mxu0 }
 0x4bd   : > { %v2161_v28 = vpop.f32.mrf.mxu1  ;;  %v2043_v29 = vadd.f32 %v2042_v27, %v2041_v24  ;;  %v1457_v30 = vadd.f32 %v1456_v19, %v1416_v26 }
 0x4bf   : > { %v1419_v31 = vadd.f32 %v2043_v29, %v1905_v20  ;;  %v1463_v33 = vmax.f32 %v1457_v30, 0.0 }
 0x4c1   : > { %v1460_v32 = vadd.f32 %v1459_v25, %v1419_v31 }
 0x4c3   : > { %v1464_v34 = vmax.f32 %v1460_v32, 0.0 }
 0x4c5   : > { %v1465_v35 = vpack.c.bf16 %v1464_v34, %v1463_v33 }
 0x4c7   : > { %2162 = vmatprep.subr.bf16.mxu0 %v1465_v35  ;;  %2180 = vmatprep.subr.bf16.mxu1 %v1465_v35 }
 0x4c8   : > { %2163 = vmatpush3.bf16.xpose.msra.mxu0 %v1465_v35  ;;  %2181 = vmatpush3.bf16.xpose.msra.mxu1 %v1465_v35 }
 0x4cf   : > { %2165 = vmatmul.mubr.bf16.vlgmr.msra.gmra.mxu0 %v2298_v36  ;;  %2173 = vmatmul.mubr.bf16.vlgmr.msra.gmra.mxu1 %v2299_v37 }
 0x4d0   : > { %2168 = vmatprep.mubr.bf16.mxu0 %v2300_v38  ;;  %2176 = vmatprep.mubr.bf16.mxu1 %v2301_v39 }
 0x4d7   : > { %2169 = vmatmul.mubr.bf16.gmra.mxu0 %v2302_v40  ;;  %2177 = vmatmul.mubr.bf16.gmra.mxu1 %v2303_v42 }
 0x58f   : > { %v2166_v58 = vpop.f32.mrf.mxu0  ;;  %v2174_v43 = vpop.f32.mrf.mxu1 }
 0x590   : > { %v1669_v59 = vadd.f32 %v2166_v58, %v1511_v47  ;;  %v1701_v60 = vadd.f32 %v2174_v43, %v1551_v54 }
 0x591   : > { %v1660_v61 = vpop.f32.mrf.mxu0  ;;  %v1692_v62 = vpop.f32.mrf.mxu1 }
 0x592   : > { %1726 = vst.msk [vmem:[%s2653_s29 + $0x10] sm:$0xff] %vm1723_vm1, %v1669_v59  ;;  %1734 = vst.msk [vmem:[%s2653_s29 + $0x50] sm:$0xff] %vm1723_vm1, %v1701_v60  ;;  %v1661_v63 = vadd.f32 %v1660_v61, %v1501_v44  ;;  %v1693_v1 = vadd.f32 %v1692_v62, %v1541_v53 }
 0x593   : > { %v2167_v2 = vpop.f32.mrf.mxu0  ;;  %v2175_v3 = vpop.f32.mrf.mxu1 }
 0x594   : > { %1724 = vst.msk [vmem:[%s2653_s29] sm:$0xff] %vm1723_vm1, %v1661_v63  ;;  %1732 = vst.msk [vmem:[%s2653_s29 + $0x40] sm:$0xff] %vm1723_vm1, %v1693_v1  ;;  %v1672_v45 = vadd.f32 %v2167_v2, %v1516_v0  ;;  %v1704_v50 = vadd.f32 %v2175_v3, %v1556_v55 }
 0x595   : > { %v1663_v5 = vpop.f32.mrf.mxu0  ;;  %v1695_v6 = vpop.f32.mrf.mxu1 }
 0x596   : > { %1727 = vst.msk [vmem:[%s2653_s29 + $0x18] sm:$0xff] %vm1723_vm1, %v1672_v45  ;;  %1735 = vst.msk [vmem:[%s2653_s29 + $0x58] sm:$0xff] %vm1723_vm1, %v1704_v50  ;;  %v1664_v7 = vadd.f32 %v1663_v5, %v1506_v46  ;;  %v1696_v8 = vadd.f32 %v1695_v6, %v1546_v41 }
 0x597   : > { %v2170_v9 = vpop.f32.mrf.mxu0  ;;  %v2178_v10 = vpop.f32.mrf.mxu1 }
 0x598   : > { %1725 = vst.msk [vmem:[%s2653_s29 + $0x8] sm:$0xff] %vm1723_vm1, %v1664_v7  ;;  %1733 = vst.msk [vmem:[%s2653_s29 + $0x48] sm:$0xff] %vm1723_vm1, %v1696_v8  ;;  %v1685_v11 = vadd.f32 %v2170_v9, %v1531_v51  ;;  %v1717_v12 = vadd.f32 %v2178_v10, %v1571_v4 }
 0x599   : > { %v1676_v13 = vpop.f32.mrf.mxu0  ;;  %v1708_v14 = vpop.f32.mrf.mxu1 }
 0x59a   : > { %1730 = vst.msk [vmem:[%s2653_s29 + $0x30] sm:$0xff] %vm1723_vm1, %v1685_v11  ;;  %1738 = vst.msk [vmem:[%s2653_s29 + $0x70] sm:$0xff] %vm1723_vm1, %v1717_v12  ;;  %v1677_v16 = vadd.f32 %v1676_v13, %v1521_v48  ;;  %v1709_v17 = vadd.f32 %v1708_v14, %v1561_v56 }
 0x59b   : > { %v2171_v18 = vpop.f32.mrf.mxu0  ;;  %v2179_v19 = vpop.f32.mrf.mxu1 }
 0x59c   : > { %1728 = vst.msk [vmem:[%s2653_s29 + $0x20] sm:$0xff] %vm1723_vm1, %v1677_v16  ;;  %1736 = vst.msk [vmem:[%s2653_s29 + $0x60] sm:$0xff] %vm1723_vm1, %v1709_v17  ;;  %v1688_v20 = vadd.f32 %v2171_v18, %v1536_v52  ;;  %v1720_v21 = vadd.f32 %v2179_v19, %v1576_v15 }
 0x59d   : > { %v1679_v22 = vpop.f32.mrf.mxu0  ;;  %v1711_v23 = vpop.f32.mrf.mxu1 }
 0x59e   : > { %1731 = vst.msk [vmem:[%s2653_s29 + $0x38] sm:$0xff] %vm1723_vm1, %v1688_v20  ;;  %1739 = vst.msk [vmem:[%s2653_s29 + $0x78] sm:$0xff] %vm1723_vm1, %v1720_v21  ;;  %v1680_v24 = vadd.f32 %v1679_v22, %v1526_v49  ;;  %v1712_v25 = vadd.f32 %v1711_v23, %v1566_v57 }
 0x5a0   : > { %1729 = vst.msk [vmem:[%s2653_s29 + $0x28] sm:$0xff] %vm1723_vm1, %v1680_v24  ;;  %1737 = vst.msk [vmem:[%s2653_s29 + $0x68] sm:$0xff] %vm1723_vm1, %v1712_v25 }
 0x5a1 PF: > { %s18_s24 = sadd.s32 1, %s2341_s24  }
 0x5a2   : > { %p15_p1 = scmp.ge.s32.totalorder %s18_s24, 4  }
 0x5a4   :  { %17 = sbr.rel (!%p15_p1) target bundleno = 1 (0x1), region = 89 }
 0x5a9   :  { %1761 = vsyncpa [#allocation4], 1 }
 0x5aa   :  { %1763 = vsyncpa [#allocation4 + $0x1], 1 }

</bundles_post_ra>
